<compile_context>
chip_gen: v6e
topology: v6e:2x2x1
jax: 0.10.0
libtpu: 0.0.40
codegen_flags: <defaults>
</compile_context>

<pallas_src>
import jax
import jax.numpy as jnp
from jax import lax
from jax.experimental import pallas as pl
from jax.experimental.pallas import tpu as pltpu


_LANE = 128
_TARGET_TILE_BYTES = 8 * 1024 * 1024   # f32 output tile target (x2 when double-buffered)
_VMEM_LIMIT_BYTES = 48 * 1024 * 1024   # fits v7x's 64 MiB physical VMEM with headroom


def _round_up(x, m):
    return (x + m - 1) // m * m


def _mf_kernel(pt_ref, q_ref, o_ref):
    # pt_ref: (Mt, k), q_ref: (k, Nt) -> o_ref: (Mt, Nt)  == one (P^T @ Q) tile.
    # f32 x f32 on the MXU with an f32 accumulator; kernel is HBM-store bound,
    # so MXU under-utilisation along the tiny K is irrelevant.
    o_ref[...] = jnp.dot(
        pt_ref[...], q_ref[...], preferred_element_type=jnp.float32
    )


def _mf_forward_whole(Pt, Qp, ncomps, nprots):
    """Genuinely tiny problems: no grid, no pipeline, whole arrays in VMEM."""
    return pl.pallas_call(
        _mf_kernel,
        out_shape=jax.ShapeDtypeStruct((ncomps, nprots), jnp.float32),
        in_specs=[
            pl.BlockSpec(memory_space=pltpu.MemorySpace.VMEM),
            pl.BlockSpec(memory_space=pltpu.MemorySpace.VMEM),
        ],
        out_specs=pl.BlockSpec(memory_space=pltpu.MemorySpace.VMEM),
    )(Pt, Qp)


def _mf_forward_rows(Pt, Qp, ncomps, nprots, tm):
    """1D 'parallel' grid over full-width row slabs; Q fully VMEM-resident."""
    k_pad = Pt.shape[1]
    grid_m = pl.cdiv(ncomps, tm)
    return pl.pallas_call(
        _mf_kernel,
        out_shape=jax.ShapeDtypeStruct((ncomps, nprots), jnp.float32),
        grid=(grid_m,),
        in_specs=[
            pl.BlockSpec((tm, k_pad), lambda i: (i, 0)),
            # Constant block index -> Q is DMAed once and stays resident.
            pl.BlockSpec((k_pad, nprots), lambda i: (0, 0)),
        ],
        out_specs=pl.BlockSpec((tm, nprots), lambda i: (i, 0)),
        compiler_params=pltpu.CompilerParams(
            dimension_semantics=("parallel",),
            vmem_limit_bytes=_VMEM_LIMIT_BYTES,
        ),
    )(Pt, Qp)


def _mf_forward_tiled(Pt, Qp, ncomps, nprots, tm, tn):
    """2D 'parallel' grid of lane-dense output tiles (very wide nprots)."""
    k_pad = Pt.shape[1]
    grid = (pl.cdiv(ncomps, tm), pl.cdiv(nprots, tn))
    return pl.pallas_call(
        _mf_kernel,
        out_shape=jax.ShapeDtypeStruct((ncomps, nprots), jnp.float32),
        grid=grid,
        in_specs=[
            pl.BlockSpec((tm, k_pad), lambda i, j: (i, 0)),
            pl.BlockSpec((k_pad, tn), lambda i, j: (0, j)),
        ],
        out_specs=pl.BlockSpec((tm, tn), lambda i, j: (i, j)),
        compiler_params=pltpu.CompilerParams(
            dimension_semantics=("parallel", "parallel"),
            vmem_limit_bytes=_VMEM_LIMIT_BYTES,
        ),
    )(Pt, Qp)


def matrix_factorization_forward(P, Q):
    """P: (k, ncomps), Q: (k, nprots) -> (ncomps, nprots) float32 == P.T @ Q."""
    k, ncomps = P.shape
    kq, nprots = Q.shape
    assert k == kq, "P and Q must share the factorization rank k"

    # Pre-transpose P once (tiny) so the kernel is a plain (tm,k)@(k,tn) matmul,
    # and zero-pad the contraction dim to a multiple of 8 for sublane alignment.
    k_pad = _round_up(k, 8)
    Pt = jnp.transpose(P)
    Qp = Q
    if k_pad != k:
        Pt = jnp.pad(Pt, ((0, 0), (0, k_pad - k)))
        Qp = jnp.pad(Qp, ((0, k_pad - k), (0, 0)))

    out_bytes = 4 * ncomps * nprots
    in_bytes = 4 * k_pad * (ncomps + nprots)

    # Tiny problems only (the default module size lands here).
    if out_bytes <= (1 << 20) and in_bytes <= (2 << 20):
        return _mf_forward_whole(Pt, Qp, ncomps, nprots)

    n_pad = _round_up(nprots, _LANE)

    # Path A: full-width row slabs whenever a >=256-row, 2-8 MiB slab fits and
    # Q's resident footprint is small. No redundant input DMA, longest stores.
    if (ncomps > _LANE
            and 256 * n_pad * 4 <= _TARGET_TILE_BYTES
            and 4 * k_pad * n_pad <= (4 << 20)):
        tm = (_TARGET_TILE_BYTES // (4 * n_pad)) // _LANE * _LANE
        tm = max(256, min(2048, tm))
        # Give megacore / v7x's two TensorCores >= 4 row slabs where possible.
        tm = min(tm, max(_LANE, _round_up(pl.cdiv(ncomps, 4), _LANE)))
        tm = min(tm, (ncomps // _LANE) * _LANE)   # block never exceeds the array
        return _mf_forward_rows(Pt, Qp, ncomps, nprots, tm)

    # Path B: 2D tiled grid (very wide nprots, or pathological k).
    tn = nprots if nprots <= _LANE else min(2048, (nprots // _LANE) * _LANE)
    if ncomps <= _LANE:
        tm = ncomps
    else:
        tm = max(256, min(512, _round_up(pl.cdiv(ncomps, 4), _LANE)))
        tm = min(tm, (ncomps // _LANE) * _LANE)
    return _mf_forward_tiled(Pt, Qp, ncomps, nprots, tm, tn)


if __name__ == "__main__":
    key = jax.random.PRNGKey(0)
    k1, k2, k3, k4, k5, k6 = jax.random.split(key, 6)
    HI = jax.lax.Precision.HIGHEST  # f32 reference (avoid bf16 reference dots)

    # 1) Default module size (ncomps=32, nprots=64, k=10): tiny whole-array path.
    P = jax.random.normal(k1, (10, 32), dtype=jnp.float32)
    Q = jax.random.normal(k2, (10, 64), dtype=jnp.float32)
    out = matrix_factorization_forward(P, Q)
    jax.block_until_ready(out)
    ref = jnp.dot(P.T, Q, precision=HI)
    assert out.shape == (32, 64)
    assert jnp.allclose(out, ref, atol=1e-4, rtol=1e-4)

    # 2) Scaled up: row-slab path (full-width N blocks, Q resident, 1D parallel grid).
    P2 = jax.random.normal(k3, (16, 512), dtype=jnp.float32)
    Q2 = jax.random.normal(k4, (16, 1024), dtype=jnp.float32)
    out2 = matrix_factorization_forward(P2, Q2)
    jax.block_until_ready(out2)
    ref2 = jnp.dot(P2.T, Q2, precision=HI)
    assert out2.shape == (512, 1024)
    assert jnp.allclose(out2, ref2, atol=1e-4, rtol=1e-4)

    # 3) Wide + ragged shapes: 2D tiled path, pl.cdiv grid, masked edge blocks.
    P3 = jax.random.normal(k5, (12, 200), dtype=jnp.float32)
    Q3 = jax.random.normal(k6, (12, 8448), dtype=jnp.float32)
    out3 = matrix_factorization_forward(P3, Q3)
    jax.block_until_ready(out3)
    ref3 = jnp.dot(P3.T, Q3, precision=HI)
    assert out3.shape == (200, 8448)
    assert jnp.allclose(out3, ref3, atol=1e-4, rtol=1e-4)

    print("KERNEL_OK")
</pallas_src>

<mosaic_0001>
module attributes {stable_mosaic.version = 11 : i64} {
  func.func @_mf_kernel(%arg0: memref<32x16xf32, #tpu.memory_space<vmem>>, %arg1: memref<16x64xf32, #tpu.memory_space<vmem>>, %arg2: memref<32x64xf32, #tpu.memory_space<vmem>>) attributes {dimension_semantics = [], scalar_prefetch = 0 : i64, scratch_operands = 0 : i64, tpu.core_type = #tpu.core_type<tc>} {
    %c0 = arith.constant 0 : index
    %c0_0 = arith.constant 0 : index
    %0 = vector.load %arg0[%c0, %c0_0] : memref<32x16xf32, #tpu.memory_space<vmem>>, vector<32x16xf32>
    %c0_1 = arith.constant 0 : index
    %c0_2 = arith.constant 0 : index
    %1 = vector.load %arg1[%c0_1, %c0_2] : memref<16x64xf32, #tpu.memory_space<vmem>>, vector<16x64xf32>
    %cst = arith.constant dense<0.000000e+00> : vector<32x64xf32>
    %2 = tpu.matmul %0, %1, %cst {dimension_numbers = #tpu.dot_dimension_numbers<[1], [0], [0], [1], [0, 0, 1, 1], [], []>} : vector<32x16xf32>, vector<16x64xf32>, vector<32x64xf32> -> vector<32x64xf32>
    %c0_3 = arith.constant 0 : index
    %c0_4 = arith.constant 0 : index
    %3 = vector.load %arg2[%c0_3, %c0_4] : memref<32x64xf32, #tpu.memory_space<vmem>>, vector<32x64xf32>
    tpu.vector_store %arg2[%c0_3, %c0_4], %2 {strides = array<i32>} : memref<32x64xf32, #tpu.memory_space<vmem>>, vector<32x64xf32>,
    return
  }
}

</mosaic_0001>

<bundles_post_ra>
// kernel: tpu_custom_call.1
= control target key start
LH: loop header
LB: loop body
LE: loop exit
PB: predicated region body
PF: predicated region fallthrough
CT: control target
= control target key end

     0   :  { %vm18_vm0 = vcmask 130048   ;;  %s225_s0 = inlined_call_operand.vmem [shape: f32[32,16], index: 0, kind: input, shape index: {}]   ;;  %s226_s1 = inlined_call_operand.vmem [shape: f32[16,64], index: 1, kind: input, shape index: {}]   ;;  %s227_s2 = inlined_call_operand.hbm [shape: f32[32,64], index: 2, kind: output, shape index: {}]  }
   0x1   :  { %v17_v0 = vld [vmem:[%s226_s1 + $0x8] sm:$0xff]  ;;  %v16_v1 = vld [vmem:[%s226_s1] sm:$0xff]  ;;  %v14_v3 = vld [vmem:[%s225_s0 + $0x10] sm:$0xff] }
   0x2   :  { %147 = vmatprep.subr.mxu0 %v17_v0  ;;  %157 = vmatprep.subr.mxu1 %v17_v0  ;;  %v12_v2 = vld [vmem:[%s225_s0] sm:$0xff] }
   0x3   :  { %148 = vmatpush3.msra.mxu0 %v17_v0  ;;  %159 = vmatpush3.msra.mxu1 %v17_v0 }
   0x4   :  { %7 = vsyncpa [#allocation3], 0  ;;  %149 = vmatprep.subr.mxu0 %v16_v1  ;;  %158 = vmatprep.subr.mxu1 %v16_v1  ;;  %v13_v4 = vld [vmem:[%s225_s0 + $0x8] sm:$0xff]  ;;  %v15_v5 = vld [vmem:[%s225_s0 + $0x18] sm:$0xff]  ;;  %s186_s20 = smov [#allocation2]   ;;  %vm116_vm1 = vcmask 523264  }
   0x5   :  { %150 = vmatpush3.msra.mxu0 %v16_v1  ;;  %160 = vmatpush3.msra.mxu1 %v16_v1  ;;  %s126_s21 = sshll.u32 %s186_s20, 4  ;;  %s127_s21 = int_to_ptr.vmem [resolvable:$true] %s126_s21 }
   0x6   :  { %151 = vmatprep.mubr.msk.f32.mxu0 %vm18_vm0, %v12_v2  ;;  %154 = vmatprep.mubr.msk.f32.mxu1 %vm18_vm0, %v14_v3  ;;  %s164_s22 = scalar_lea.vmem %s127_s21, 512  ;;  %p169_p1 = scmp.lt.s32.totalorder %s127_s21, %s127_s21 }
   0x7   :  { %152 = vmatmul.mubr.msk.f32.vlgmr.msra.gmra.mxu0 %vm18_vm0, %v13_v4  ;;  %155 = vmatmul.mubr.msk.f32.vlgmr.msra.gmra.mxu1 %vm18_vm0, %v15_v5  ;;  %p165_p0 = scmp.ne.s32.totalorder %s127_s21, %s164_s22  ;;  %p170_p2 = scmp.lt.s32.totalorder %s164_s22, %s164_s22 }
   0x9   :  { %p171_p3 = por %p170_p2, %p169_p1 }
   0xb   :  { %p172_p4 = pnand %p171_p3, %p165_p0 }
  0xc7   :  { %v153_v6 = vpop.f32.mrf.mxu0  ;;  %v156_v7 = vpop.f32.mrf.mxu1 }
  0xc8   :  { %118 = vst.msk [vmem:[#allocation2 + $0x8] sm:$0xff] %vm116_vm1, %v153_v6  ;;  %120 = vst.msk [vmem:[#allocation2 + $0x18] sm:$0xff] %vm116_vm1, %v156_v7 }
  0xc9   :  { %v97_v8 = vpop.f32.mrf.mxu0  ;;  %v107_v9 = vpop.f32.mrf.mxu1 }
  0xca   :  { %117 = vst.msk [vmem:[#allocation2] sm:$0xff] %vm116_vm1, %v97_v8  ;;  %119 = vst.msk [vmem:[#allocation2 + $0x10] sm:$0xff] %vm116_vm1, %v107_v9 }
  0xcb   :  { %175 = shalt.err (!%p172_p4)
}
  0xcc   :  { %s187_s0 = smov 128   ;;  %s188_s23 = smov 8  }
  0xcd   :  { %132 = dma.vmem_to_hbm [thread:$0]  %s127_s21, 512, %s227_s2, [#allocation3], %s187_s0, %s187_s0, %s188_s23  }
  0xce   :  { %184 = dma.done.wait [#allocation3], 512  }
  0xcf   :  { %185 = vsyncadd [#allocation3], 4294966784 }
  0xd0   :  { %136 = vsyncpa [#allocation3], 1 }

</bundles_post_ra>
